<compile_context>
chip_gen: v7x
topology: tpu7x:2x2x1
jax: 0.10.0
libtpu: 0.0.40
codegen_flags: <defaults>
</compile_context>

<pallas_src>
import functools

import jax
import jax.numpy as jnp
from jax.experimental import pallas as pl
from jax.experimental.pallas import tpu as pltpu


def _round_up(x: int, m: int) -> int:
    return ((x + m - 1) // m) * m


def _cdiv(x: int, m: int) -> int:
    return (x + m - 1) // m


def _vq_kernel(z_ref, neg2e_ref, e2_ref, et_ref, zq_ref, idx_ref, sse_ref,
               *, hw: int, n_codes: int):
    """One grid step = one (C, T) channel-on-sublane tile of one batch image.

    z_ref     : (1, C, T)      latents tile (f32); C == embedding_dim on sublanes
    neg2e_ref : (K, C)         -2 * codebook (resident)
    e2_ref    : (K, 1)         per-code squared norms ||e_k||^2 (resident)
    et_ref    : (C, K)         codebook^T (resident, exact-gather LHS)
    zq_ref    : (1, C, T)      quantized output tile
    idx_ref   : (1, 1, T)      nearest-code indices (lane-dense int32 row)
    sse_ref   : (1, 1, 1, 128) this tile's masked sum of squared error
    """
    t = pl.program_id(1)
    zt = z_ref[0]                                            # (C, T) f32
    k = n_codes
    tl = zt.shape[1]

    # dist^T up to the row-constant ||z||^2 (argmin-invariant):
    #   (K, T) = (-2 E)(K, D) @ z(D, T)  +  ||e||^2 (K, 1)
    dist = jnp.dot(neg2e_ref[...], zt, preferred_element_type=jnp.float32)
    dist = dist + e2_ref[...]                                # one (K, T) VALU pass

    # First-match argmin over the K (sublane) axis: plain min + equality +
    # index-min.  Matches torch.argmin's lowest-index tie behavior exactly,
    # without an index-tracking reduce.
    min_d = jnp.min(dist, axis=0, keepdims=True)             # (1, T)
    iota_k = jax.lax.broadcasted_iota(jnp.int32, (k, tl), 0) # (K, T)
    hit = dist == min_d                                      # (K, T) bool
    idx = jnp.min(jnp.where(hit, iota_k, k), axis=0, keepdims=True)  # (1, T)
    idx = idx.astype(jnp.int32)

    # Exact one-hot (single code per column even on ties) -> MXU gather with a
    # full 128-deep contraction; z_q columns are bit-exact codebook rows.
    onehot = (iota_k == idx).astype(jnp.float32)             # (K, T)
    zq = jnp.dot(et_ref[...], onehot, preferred_element_type=jnp.float32)  # (C, T)

    zq_ref[...] = zq[None].astype(zq_ref.dtype)
    idx_ref[...] = idx[None]

    # Per-tile SSE partial, masked to in-bounds spatial positions (boundary
    # tiles of a non-divisible H*W read garbage lanes -> forced to 0 here).
    diff = zq - zt
    d2 = jnp.sum(diff * diff, axis=0, keepdims=True)         # (1, T)
    lane = jax.lax.broadcasted_iota(jnp.int32, (1, tl), 1)
    valid = (t * tl + lane) < hw
    sse = jnp.sum(jnp.where(valid, d2, 0.0))
    sse_ref[...] = jnp.broadcast_to(sse, sse_ref.shape)


def _choose_tile(hw: int, batch: int, tile_hw: int) -> int:
    """Spatial tile width (lanes)."""
    if hw <= 128:
        return hw                          # single full-width tile (block == full dim)
    # Ensure >= 2 total programs when possible so v7x can shard across both TCs.
    min_tiles = _cdiv(2, batch)
    t = min(int(tile_hw), _round_up(_cdiv(hw, min_tiles), 128))
    return max(128, (t // 128) * 128)


@functools.partial(jax.jit, static_argnames=("beta", "tile_hw"))
def vector_quantize(z, codebook, *, beta: float = 0.25, tile_hw: int = 2048):
    """Pallas VQ forward.

    z:        (B, C, H, W) float (NCHW, as in the PyTorch module)
    codebook: (K, D) float with D == C

    Returns (z_q_st, vq_loss, indices) matching the PyTorch forward values.
    tile_hw (spatial lanes per step) can be raised to 4096-8192 on v6e; the
    default 2048 keeps (K, T) intermediates at ~1 MiB each on every generation.
    """
    B, C, H, W = z.shape
    K, D = codebook.shape
    assert D == C, "embedding_dim must equal the channel dim"
    HW = H * W

    # NCHW -> (B, C, H*W): a pure reshape, no transpose / extra HBM traffic.
    z3 = z.reshape(B, C, HW).astype(jnp.float32)

    e = codebook.astype(jnp.float32)
    neg2e = -2.0 * e                                     # (K, D)
    e2 = jnp.sum(e * e, axis=1, keepdims=True)           # (K, 1)
    et = jnp.transpose(e)                                # (D, K)

    t_hw = _choose_tile(HW, B, tile_hw)
    n_t = _cdiv(HW, t_hw)

    kernel = functools.partial(_vq_kernel, hw=HW, n_codes=K)

    zq3, idx3, sse = pl.pallas_call(
        kernel,
        out_shape=(
            jax.ShapeDtypeStruct((B, C, HW), jnp.float32),
            jax.ShapeDtypeStruct((B, 1, HW), jnp.int32),
            jax.ShapeDtypeStruct((B, n_t, 1, 128), jnp.float32),
        ),
        grid_spec=pltpu.PrefetchScalarGridSpec(
            num_scalar_prefetch=0,
            grid=(B, n_t),
            in_specs=[
                pl.BlockSpec((1, C, t_hw), lambda b, t: (b, 0, t)),   # z tile
                pl.BlockSpec((K, D), lambda b, t: (0, 0)),            # -2 E
                pl.BlockSpec((K, 1), lambda b, t: (0, 0)),            # ||e||^2
                pl.BlockSpec((D, K), lambda b, t: (0, 0)),            # E^T
            ],
            out_specs=[
                pl.BlockSpec((1, C, t_hw), lambda b, t: (b, 0, t)),       # z_q
                pl.BlockSpec((1, 1, t_hw), lambda b, t: (b, 0, t)),       # idx
                pl.BlockSpec((1, 1, 1, 128), lambda b, t: (b, t, 0, 0)),  # SSE
            ],
        ),
        compiler_params=pltpu.CompilerParams(
            # Every output block is written by exactly one grid step, so both
            # grid axes are truly parallel (v7x shards them across its two TCs).
            dimension_semantics=("parallel", "parallel"),
            vmem_limit_bytes=32 * 1024 * 1024,
        ),
    )(z3, neg2e, e2, et)

    z_q = zq3.reshape(B, C, H, W)
    indices = idx3.reshape(B, H, W)

    # codebook_loss and commitment_loss share the same *forward* value (they
    # differ only in which side is detached):
    mse = jnp.sum(sse[:, :, 0, 0]) / jnp.float32(B * C * H * W)
    vq_loss = mse + beta * mse

    # Straight-through estimator: forward value is exactly z_q.
    z_q_st = z_q

    # TODO(synk): code_usage index_add_ buffer update (training-only, stateful)
    # has no place in a pure functional forward kernel; omitted.
    return z_q_st, vq_loss, indices


def _reference(z, codebook, beta):
    """Pure-JAX reference for correctness checking."""
    B, C, H, W = z.shape
    z_flat = jnp.transpose(z, (0, 2, 3, 1)).reshape(-1, C).astype(jnp.float32)
    d = (jnp.sum(z_flat ** 2, axis=1, keepdims=True)
         + jnp.sum(codebook ** 2, axis=1)[None, :]
         - 2.0 * z_flat @ codebook.T)
    idx = jnp.argmin(d, axis=1)
    zq_flat = codebook[idx]
    z_q = jnp.transpose(zq_flat.reshape(B, H, W, C), (0, 3, 1, 2))
    mse = jnp.mean((z_q - z) ** 2)
    return z_q, mse + beta * mse, idx.reshape(B, H, W)


if __name__ == "__main__":
    # Config (small, consistent with the module):
    #   codebook_size = 128, embedding_dim = 8, beta = 0.25
    B, C, H, W = 2, 8, 16, 16          # z: (B, C, H, W), C == embedding_dim
    K = 128                            # codebook_size
    beta = 0.25

    key = jax.random.PRNGKey(0)
    k_z, k_e = jax.random.split(key)
    z = jax.random.normal(k_z, (B, C, H, W), dtype=jnp.float32)
    # nn.Embedding weight init: uniform(-1/embedding_dim, 1/embedding_dim)
    codebook = jax.random.uniform(
        k_e, (K, C), dtype=jnp.float32, minval=-1.0 / C, maxval=1.0 / C)

    z_q_st, vq_loss, indices = vector_quantize(z, codebook, beta=beta)
    jax.block_until_ready((z_q_st, vq_loss, indices))

    # Sanity-check against the pure-JAX reference.
    zq_ref, loss_ref, idx_ref = _reference(z, codebook, beta)
    assert z_q_st.shape == (B, C, H, W) and z_q_st.dtype == jnp.float32
    assert indices.shape == (B, H, W)
    assert jnp.allclose(z_q_st, zq_ref, atol=1e-5)
    assert jnp.allclose(vq_loss, loss_ref, atol=1e-5)
    assert jnp.array_equal(indices, idx_ref)

    print("KERNEL_OK")
</pallas_src>

<mosaic_0001>
module attributes {stable_mosaic.version = 11 : i64} {
  func.func @_vq_kernel(%arg0: i32, %arg1: i32, %arg2: memref<1x8x256xf32, #tpu.memory_space<vmem>>, %arg3: memref<128x8xf32, #tpu.memory_space<vmem>>, %arg4: memref<128x1xf32, #tpu.memory_space<vmem>>, %arg5: memref<8x128xf32, #tpu.memory_space<vmem>>, %arg6: memref<1x8x256xf32, #tpu.memory_space<vmem>>, %arg7: memref<1x1x256xi32, #tpu.memory_space<vmem>>, %arg8: memref<1x1x1x128xf32, #tpu.memory_space<vmem>>) attributes {dimension_semantics = [#tpu.dimension_semantics<parallel>, #tpu.dimension_semantics<parallel>], iteration_bounds = array<i64: 2, 1>, scalar_prefetch = 0 : i64, scratch_operands = 0 : i64, tpu.core_type = #tpu.core_type<tc>, window_params = [{transform_indices = @transform_0, window_bounds = array<i64: 1, 8, 256>}, {pipeline_mode = #tpu.pipeline_mode<synchronous>, transform_indices = @transform_1, window_bounds = array<i64: 128, 8>}, {pipeline_mode = #tpu.pipeline_mode<synchronous>, transform_indices = @transform_2, window_bounds = array<i64: 128, 1>}, {pipeline_mode = #tpu.pipeline_mode<synchronous>, transform_indices = @transform_3, window_bounds = array<i64: 8, 128>}, {transform_indices = @transform_4, window_bounds = array<i64: 1, 8, 256>}, {transform_indices = @transform_5, window_bounds = array<i64: 1, 1, 256>}, {transform_indices = @transform_6, window_bounds = array<i64: 1, 1, 1, 128>}]} {
    %c0 = arith.constant 0 : index
    %c0_0 = arith.constant 0 : index
    %c0_1 = arith.constant 0 : index
    %0 = vector.load %arg2[%c0, %c0_0, %c0_1] : memref<1x8x256xf32, #tpu.memory_space<vmem>>, vector<1x8x256xf32>
    %1 = vector.shape_cast %0 : vector<1x8x256xf32> to vector<8x256xf32>
    %c0_2 = arith.constant 0 : index
    %c0_3 = arith.constant 0 : index
    %2 = vector.load %arg3[%c0_2, %c0_3] : memref<128x8xf32, #tpu.memory_space<vmem>>, vector<128x8xf32>
    %cst = arith.constant dense<0.000000e+00> : vector<128x256xf32>
    %3 = tpu.matmul %2, %1, %cst {dimension_numbers = #tpu.dot_dimension_numbers<[1], [0], [0], [1], [0, 0, 1, 1], [], []>} : vector<128x8xf32>, vector<8x256xf32>, vector<128x256xf32> -> vector<128x256xf32>
    %c0_4 = arith.constant 0 : index
    %c0_5 = arith.constant 0 : index
    %4 = vector.load %arg4[%c0_4, %c0_5] : memref<128x1xf32, #tpu.memory_space<vmem>>, vector<128x1xf32>
    %5 = vector.broadcast %4 : vector<128x1xf32> to vector<128x256xf32>
    %6 = arith.addf %3, %5 : vector<128x256xf32>
    %cst_6 = arith.constant dense<0x7F800000> : vector<256xf32>
    %7 = vector.multi_reduction <minimumf>, %6, %cst_6 [0] : vector<128x256xf32> to vector<256xf32>
    %8 = vector.shape_cast %7 : vector<256xf32> to vector<1x256xf32>
    %9 = tpu.iota {dimensions = array<i32: 0>} : vector<128x256xi32>
    %10 = vector.broadcast %8 : vector<1x256xf32> to vector<128x256xf32>
    %11 = arith.cmpf oeq, %6, %10 : vector<128x256xf32>
    %c128_i32 = arith.constant 128 : i32
    %12 = vector.broadcast %c128_i32 : i32 to vector<128x256xi32>
    %13 = arith.select %11, %9, %12 : vector<128x256xi1>, vector<128x256xi32>
    %cst_7 = arith.constant dense<2147483647> : vector<256xi32>
    %14 = vector.multi_reduction <minsi>, %13, %cst_7 [0] : vector<128x256xi32> to vector<256xi32>
    %15 = vector.shape_cast %14 : vector<256xi32> to vector<1x256xi32>
    %16 = vector.broadcast %15 : vector<1x256xi32> to vector<128x256xi32>
    %17 = arith.cmpi eq, %9, %16 : vector<128x256xi32>
    %18 = arith.extui %17 : vector<128x256xi1> to vector<128x256xi32>
    %19 = arith.sitofp %18 : vector<128x256xi32> to vector<128x256xf32>
    %c0_8 = arith.constant 0 : index
    %c0_9 = arith.constant 0 : index
    %20 = vector.load %arg5[%c0_8, %c0_9] : memref<8x128xf32, #tpu.memory_space<vmem>>, vector<8x128xf32>
    %cst_10 = arith.constant dense<0.000000e+00> : vector<8x256xf32>
    %21 = tpu.matmul %20, %19, %cst_10 {dimension_numbers = #tpu.dot_dimension_numbers<[1], [0], [0], [1], [0, 0, 1, 1], [], []>} : vector<8x128xf32>, vector<128x256xf32>, vector<8x256xf32> -> vector<8x256xf32>
    %22 = vector.shape_cast %21 : vector<8x256xf32> to vector<1x8x256xf32>
    %c0_11 = arith.constant 0 : index
    %c0_12 = arith.constant 0 : index
    %c0_13 = arith.constant 0 : index
    %23 = vector.load %arg6[%c0_11, %c0_12, %c0_13] : memref<1x8x256xf32, #tpu.memory_space<vmem>>, vector<1x8x256xf32>
    tpu.vector_store %arg6[%c0_11, %c0_12, %c0_13], %22 {strides = array<i32>} : memref<1x8x256xf32, #tpu.memory_space<vmem>>, vector<1x8x256xf32>,
    %24 = vector.shape_cast %15 : vector<1x256xi32> to vector<1x1x256xi32>
    %c0_14 = arith.constant 0 : index
    %c0_15 = arith.constant 0 : index
    %c0_16 = arith.constant 0 : index
    %25 = vector.load %arg7[%c0_14, %c0_15, %c0_16] : memref<1x1x256xi32, #tpu.memory_space<vmem>>, vector<1x1x256xi32>
    tpu.vector_store %arg7[%c0_14, %c0_15, %c0_16], %24 {strides = array<i32>} : memref<1x1x256xi32, #tpu.memory_space<vmem>>, vector<1x1x256xi32>,
    %26 = arith.subf %21, %1 : vector<8x256xf32>
    %27 = arith.mulf %26, %26 : vector<8x256xf32>
    %cst_17 = arith.constant dense<0.000000e+00> : vector<256xf32>
    %28 = vector.multi_reduction <add>, %27, %cst_17 [0] : vector<8x256xf32> to vector<256xf32>
    %29 = vector.shape_cast %28 : vector<256xf32> to vector<1x256xf32>
    %30 = tpu.iota {dimensions = array<i32: 1>} : vector<1x256xi32>
    %c256_i32 = arith.constant 256 : i32
    %31 = arith.muli %arg1, %c256_i32 : i32
    %32 = vector.broadcast %31 : i32 to vector<1x256xi32>
    %33 = arith.addi %32, %30 : vector<1x256xi32>
    %c256_i32_18 = arith.constant 256 : i32
    %34 = vector.broadcast %c256_i32_18 : i32 to vector<1x256xi32>
    %35 = arith.cmpi slt, %33, %34 : vector<1x256xi32>
    %cst_19 = arith.constant 0.000000e+00 : f32
    %36 = vector.broadcast %cst_19 : f32 to vector<1x256xf32>
    %37 = arith.select %35, %29, %36 : vector<1x256xi1>, vector<1x256xf32>
    %38 = vector.shape_cast %37 : vector<1x256xf32> to vector<1x1x256xf32>
    %cst_20 = arith.constant dense<0.000000e+00> : vector<1xf32>
    %39 = vector.multi_reduction <add>, %38, %cst_20 [1, 2] : vector<1x1x256xf32> to vector<1xf32>
    %40 = vector.shape_cast %39 : vector<1xf32> to vector<1x1x1xf32>
    %41 = vector.extract %40[0, 0, 0] : f32 from vector<1x1x1xf32>
    %42 = vector.broadcast %41 : f32 to vector<1x1x1x128xf32>
    %c0_21 = arith.constant 0 : index
    %c0_22 = arith.constant 0 : index
    %c0_23 = arith.constant 0 : index
    %c0_24 = arith.constant 0 : index
    %43 = vector.load %arg8[%c0_21, %c0_22, %c0_23, %c0_24] : memref<1x1x1x128xf32, #tpu.memory_space<vmem>>, vector<1x1x1x128xf32>
    tpu.vector_store %arg8[%c0_21, %c0_22, %c0_23, %c0_24], %42 {strides = array<i32>} : memref<1x1x1x128xf32, #tpu.memory_space<vmem>>, vector<1x1x1x128xf32>,
    return
  }
  func.func @transform_0(%arg0: i32, %arg1: i32) -> (i32, i32, i32) {
    %c0_i32 = arith.constant 0 : i32
    %c0_i32_0 = arith.constant 0 : i32
    return %arg0, %c0_i32, %arg1 : i32, i32, i32
  }
  func.func @transform_1(%arg0: i32, %arg1: i32) -> (i32, i32) {
    %c0_i32 = arith.constant 0 : i32
    %c0_i32_0 = arith.constant 0 : i32
    %c0_i32_1 = arith.constant 0 : i32
    return %c0_i32, %c0_i32_0 : i32, i32
  }
  func.func @transform_2(%arg0: i32, %arg1: i32) -> (i32, i32) {
    %c0_i32 = arith.constant 0 : i32
    %c0_i32_0 = arith.constant 0 : i32
    %c0_i32_1 = arith.constant 0 : i32
    return %c0_i32, %c0_i32_0 : i32, i32
  }
  func.func @transform_3(%arg0: i32, %arg1: i32) -> (i32, i32) {
    %c0_i32 = arith.constant 0 : i32
    %c0_i32_0 = arith.constant 0 : i32
    %c0_i32_1 = arith.constant 0 : i32
    return %c0_i32, %c0_i32_0 : i32, i32
  }
  func.func @transform_4(%arg0: i32, %arg1: i32) -> (i32, i32, i32) {
    %c0_i32 = arith.constant 0 : i32
    %c0_i32_0 = arith.constant 0 : i32
    return %arg0, %c0_i32, %arg1 : i32, i32, i32
  }
  func.func @transform_5(%arg0: i32, %arg1: i32) -> (i32, i32, i32) {
    %c0_i32 = arith.constant 0 : i32
    %c0_i32_0 = arith.constant 0 : i32
    return %arg0, %c0_i32, %arg1 : i32, i32, i32
  }
  func.func @transform_6(%arg0: i32, %arg1: i32) -> (i32, i32, i32, i32) {
    %c0_i32 = arith.constant 0 : i32
    %c0_i32_0 = arith.constant 0 : i32
    %c0_i32_1 = arith.constant 0 : i32
    return %arg0, %arg1, %c0_i32, %c0_i32_0 : i32, i32, i32, i32
  }
}

</mosaic_0001>

<bundles_post_ra>
// kernel: vector_quantize.1
= control target key start
LH: loop header
LB: loop body
LE: loop exit
PB: predicated region body
PF: predicated region fallthrough
CT: control target
= control target key end

     0   :  { %s1473_s21 = smov 0   ;;  %s1475_s22 = smov 0   ;;  %s2073_s0 = inlined_call_operand.vmem [shape: f32[2,8,256], index: 0, kind: input, shape index: {}]   ;;  %s2074_s1 = inlined_call_operand.vmem [shape: f32[128,8], index: 1, kind: input, shape index: {}]   ;;  %s2075_s2 = inlined_call_operand.vmem [shape: f32[128,1], index: 2, kind: input, shape index: {}]   ;;  %s2076_s3 = inlined_call_operand.vmem [shape: f32[8,128], index: 3, kind: input, shape index: {}]   ;;  %s2077_s4 = inlined_call_operand.vmem [shape: f32[2,8,256], index: 4, kind: output, shape index: {0}]   ;;  %s2078_s5 = inlined_call_operand.vmem [shape: s32[2,1,256], index: 5, kind: output, shape index: {1}]   ;;  %s2079_s6 = inlined_call_operand.vmem [shape: f32[2,1,1,128], index: 6, kind: output, shape index: {2}]  }
   0x1   :  { %s1477_s23 = smov 0  }
   0x2 LB: > { %s29_s24 = sadd.s32 1, %s1428_s22  ;;  %p1256_p0 = scmp.ge.s32.totalorder %s1432_s23, 1  ;;  %s1432_s23 = sphi %s1477_s23, %s17_s23   ;;  %s1428_s22 = sphi %s1475_s22, %s2089_s22   ;;  %s1424_s21 = sphi %s1473_s21, %s2088_s21  }
   0x3   : > { %p31_p1 = scmp.ge.s32.totalorder %s29_s24, 2  ;;  %p242_p2 = scmp.lt.s32.totalorder %s1432_s23, 3 }
   0x5   : > { %s2091_s24 = smov (%p31_p1, %s29_s24), 0  ;;  %p243_p3 = pnand %p1256_p0, %p242_p2 }
   0x6   : > { %p295_p4 = scmp.lt.s32.totalorder (!%p243_p3), %s1424_s21, 1  ;;  %v1434_v0 = vmov (!%p243_p3), 0.0   ;;  %v1435_v1 = vmov (!%p243_p3), 0   ;;  %v331_v2 = vld [vmem:[%s2074_s1] sm:$0xff] (!%p243_p3)  ;;  %vm443_vm0 = vcmask (!%p243_p3), 64512   ;;  %v349_v6 = vld [vmem:[%s2075_s2 + $0x10] sm:$0xff] (!%p243_p3) }
   0x7   : > { %246 = sbr.rel (%p243_p3) target bundleno = 830 (0x33e), region = 36  ;;  %556 = vmatprep.mubr.f32.mxu0 (!%p243_p3), %v1434_v0  ;;  %1015 = vmatprep.mubr.f32.mxu1 (!%p243_p3), %v1434_v0  ;;  %v347_v3 = vld [vmem:[%s2075_s2] sm:$0xff] (!%p243_p3)  ;;  %v348_v7 = vld [vmem:[%s2075_s2 + $0x8] sm:$0xff] (!%p243_p3)  ;;  %v350_v8 = vld [vmem:[%s2075_s2 + $0x18] sm:$0xff] (!%p243_p3) }
   0x8   : > { %1408 = vset.pattern.permute.xlu0 (!%p243_p3), %v1435_v1  ;;  %1409 = vset.pattern.permute.xlu1 (!%p243_p3), %v1435_v1  ;;  %v332_v9 = vld [vmem:[%s2074_s1 + $0x8] sm:$0xff] (!%p243_p3)  ;;  %v351_v10 = vld [vmem:[%s2075_s2 + $0x20] sm:$0xff] (!%p243_p3)  ;;  %v333_v12 = vld [vmem:[%s2074_s1 + $0x10] sm:$0xff] (!%p243_p3) }
   0x9   : > { %365 = vperm.xlu0 (!%p243_p3), %1408, %v347_v3   ;;  %375 = vperm.xlu1 (!%p243_p3), %1409, %v349_v6   ;;  %v352_v11 = vld [vmem:[%s2075_s2 + $0x28] sm:$0xff] (!%p243_p3)  ;;  %v353_v13 = vld [vmem:[%s2075_s2 + $0x30] sm:$0xff] (!%p243_p3)  ;;  %v354_v14 = vld [vmem:[%s2075_s2 + $0x38] sm:$0xff] (!%p243_p3) }
   0xa   : > { %v334_v15 = vld [vmem:[%s2074_s1 + $0x18] sm:$0xff] (!%p243_p3)  ;;  %v355_v16 = vld [vmem:[%s2075_s2 + $0x40] sm:$0xff] (!%p243_p3)  ;;  %v356_v17 = vld [vmem:[%s2075_s2 + $0x48] sm:$0xff] (!%p243_p3) }
   0xb   : > { %v335_v18 = vld [vmem:[%s2074_s1 + $0x20] sm:$0xff] (!%p243_p3)  ;;  %v357_v19 = vld [vmem:[%s2075_s2 + $0x50] sm:$0xff] (!%p243_p3)  ;;  %v358_v20 = vld [vmem:[%s2075_s2 + $0x58] sm:$0xff] (!%p243_p3) }
   0xc   : > { %v336_v21 = vld [vmem:[%s2074_s1 + $0x28] sm:$0xff] (!%p243_p3)  ;;  %v359_v22 = vld [vmem:[%s2075_s2 + $0x60] sm:$0xff] (!%p243_p3)  ;;  %v337_v24 = vld [vmem:[%s2074_s1 + $0x30] sm:$0xff] (!%p243_p3) }
   0xd   : > { %370 = vperm.xlu0 (!%p243_p3), %1408, %v348_v7   ;;  %380 = vperm.xlu1 (!%p243_p3), %1409, %v350_v8   ;;  %v360_v23 = vld [vmem:[%s2075_s2 + $0x68] sm:$0xff] (!%p243_p3)  ;;  %v361_v25 = vld [vmem:[%s2075_s2 + $0x70] sm:$0xff] (!%p243_p3)  ;;  %v362_v26 = vld [vmem:[%s2075_s2 + $0x78] sm:$0xff] (!%p243_p3) }
   0xe   : > { %s2093_s21 = smov (!%p295_p4, %s1424_s21), 1  ;;  %v338_v27 = vld [vmem:[%s2074_s1 + $0x38] sm:$0xff]  ;;  %v339_v28 = vld [vmem:[%s2074_s1 + $0x40] sm:$0xff]  ;;  %v340_v29 = vld [vmem:[%s2074_s1 + $0x48] sm:$0xff] }
   0xf   : > { %s1344_s25 = sshll.u32 %s2093_s21, 4  ;;  %v341_v30 = vld [vmem:[%s2074_s1 + $0x50] sm:$0xff]  ;;  %v342_v31 = vld [vmem:[%s2074_s1 + $0x58] sm:$0xff]  ;;  %v343_v32 = vld [vmem:[%s2074_s1 + $0x60] sm:$0xff]  ;;  %s1261_s12 = sshll.u32 %s2093_s21, 1 }
  0x10   : > { %s302_s28 = scalar_lea.vmem %s2073_s0, %s1344_s25  ;;  %v344_v33 = vld [vmem:[%s2074_s1 + $0x68] sm:$0xff]  ;;  %v345_v34 = vld [vmem:[%s2074_s1 + $0x70] sm:$0xff]  ;;  %v346_v35 = vld [vmem:[%s2074_s1 + $0x78] sm:$0xff]  ;;  %s321_s15 = scalar_lea.vmem %s2078_s5, %s1261_s12 }
  0x11   : > { %v1507_v4 = vld [vmem:[%s302_s28 + $0x8] sm:$0xff]  ;;  %v1509_v5 = vld [vmem:[%s302_s28] sm:$0xff]  ;;  %385 = vperm.xlu0 %1408, %v351_v10   ;;  %390 = vperm.xlu1 %1409, %v352_v11   ;;  %s312_s20 = scalar_lea.vmem %s2077_s4, %s1344_s25  ;;  %s328_s27 = scalar_lea.vmem %s2079_s6, %s2093_s21 }
  0x12   : > { %492 = vmatprep.subr.mxu0 %v1507_v4 }
  0x13   : > { %493 = vmatpush1.msra.mxu0 %v1509_v5 }
  0x14   : > { %1262 = vmatmul.mubr.msk.f32.vlgmr.msra.gmra.mrb[0].mxu0 %vm443_vm0, %v331_v2 }
  0x15   : > { %562 = vmatprep.mubr.f32.mxu0 %v1434_v0  ;;  %395 = vperm.xlu0 %1408, %v353_v13  }
  0x16   : > { %400 = vperm.xlu1 %1409, %v354_v14  }
  0x18   : > { %1263 = vmatmul.mubr.msk.f32.gmra.mrb[2].mxu0 %vm443_vm0, %v332_v9 }
  0x19   : > { %568 = vmatprep.mubr.f32.mxu0 %v1434_v0  ;;  %405 = vperm.xlu0 %1408, %v355_v16  }
  0x1a   : > { %410 = vperm.xlu1 %1409, %v356_v17  }
  0x1c   : > { %1264 = vmatmul.mubr.msk.f32.gmra.mrb[4].mxu0 %vm443_vm0, %v333_v12 }
  0x1d   : > { %574 = vmatprep.mubr.f32.mxu0 %v1434_v0  ;;  %415 = vperm.xlu0 %1408, %v357_v19  }
  0x1e   : > { %420 = vperm.xlu1 %1409, %v358_v20  }
  0x20   : > { %1265 = vmatmul.mubr.msk.f32.gmra.mrb[6].mxu0 %vm443_vm0, %v334_v15 }
  0x21   : > { %580 = vmatprep.mubr.f32.mxu0 %v1434_v0  ;;  %425 = vperm.xlu0 %1408, %v359_v22  }
  0x22   : > { %430 = vperm.xlu1 %1409, %v360_v23  }
  0x24   : > { %1266 = vmatmul.mubr.msk.f32.gmra.mrb[8].mxu0 %vm443_vm0, %v335_v18 }
  0x25   : > { %586 = vmatprep.mubr.f32.mxu0 %v1434_v0  ;;  %435 = vperm.xlu0 %1408, %v361_v25  }
  0x26   : > { %440 = vperm.xlu1 %1409, %v362_v26  }
  0x28   : > { %1267 = vmatmul.mubr.msk.f32.gmra.mrb[10].mxu0 %vm443_vm0, %v336_v21 }
  0x29   : > { %592 = vmatprep.mubr.f32.mxu0 %v1434_v0 }
  0x2c   : > { %1268 = vmatmul.mubr.msk.f32.gmra.mrb[12].mxu0 %vm443_vm0, %v337_v24 }
  0x2d   : > { %598 = vmatprep.mubr.f32.mxu0 %v1434_v0 }
  0x30   : > { %1269 = vmatmul.mubr.msk.f32.gmra.mrb[14].mxu0 %vm443_vm0, %v338_v27 }
  0x31   : > { %604 = vmatprep.mubr.f32.mxu0 %v1434_v0 }
  0x34   : > { %1270 = vmatmul.mubr.msk.f32.gmra.mrb[16].mxu0 %vm443_vm0, %v339_v28 }
  0x35   : > { %610 = vmatprep.mubr.f32.mxu0 %v1434_v0 }
  0x38   : > { %1271 = vmatmul.mubr.msk.f32.gmra.mrb[18].mxu0 %vm443_vm0, %v340_v29 }
  0x39   : > { %616 = vmatprep.mubr.f32.mxu0 %v1434_v0 }
  0x3c   : > { %1272 = vmatmul.mubr.msk.f32.gmra.mrb[20].mxu0 %vm443_vm0, %v341_v30 }
  0x3d   : > { %622 = vmatprep.mubr.f32.mxu0 %v1434_v0 }
  0x40   : > { %1273 = vmatmul.mubr.msk.f32.gmra.mrb[22].mxu0 %vm443_vm0, %v342_v31 }
  0x41   : > { %628 = vmatprep.mubr.f32.mxu0 %v1434_v0 }
  0x44   : > { %1274 = vmatmul.mubr.msk.f32.gmra.mrb[24].mxu0 %vm443_vm0, %v343_v32 }
  0x45   : > { %634 = vmatprep.mubr.f32.mxu0 %v1434_v0 }
  0x48   : > { %1275 = vmatmul.mubr.msk.f32.gmra.mrb[26].mxu0 %vm443_vm0, %v344_v33 }
  0x49   : > { %640 = vmatprep.mubr.f32.mxu0 %v1434_v0 }
  0x4c   : > { %1276 = vmatmul.mubr.msk.f32.gmra.mrb[28].mxu0 %vm443_vm0, %v345_v34 }
  0x4d   : > { %646 = vmatprep.mubr.f32.mxu0 %v1434_v0 }
  0x50   : > { %1277 = vmatmul.mubr.msk.f32.gmra.mrb[30].mxu0 %vm443_vm0, %v346_v35 }
  0x88   : > { %v366_v38 = vpop.permute.xlu0 %365  ;;  %v376_v41 = vpop.permute.xlu1 %375 }
  0x8c   : > { %v371_v47 = vpop.permute.xlu0 %370  ;;  %v381_v50 = vpop.permute.xlu1 %380 }
  0x90   : > { %v386_v59 = vpop.permute.xlu0 %385  ;;  %v391_v2 = vpop.permute.xlu1 %390 }
  0x94   : > { %v396_v11 = vpop.permute.xlu0 %395 }
  0x95   : > { %v401_v18 = vpop.permute.xlu1 %400 }
  0x98   : > { %v406_v25 = vpop.permute.xlu0 %405 }
  0x99   : > { %v411_v32 = vpop.permute.xlu1 %410 }
  0xe7   : > { %v558_v36 = vpop.f32.mrb[0].mxu0 }
  0xe8   : > { %v560_v37 = vpop.f32.mrb[1].mxu0  ;;  %v1634_v43 = vadd.f32 %v558_v36, %v366_v38 }
  0xe9   : > { %v1638_v46 = vadd.f32 %v560_v37, %v366_v38 }
  0xeb   : > { %v564_v39 = vpop.f32.mrb[2].mxu0 }
  0xec   : > { %v566_v40 = vpop.f32.mrb[3].mxu0  ;;  %v1646_v53 = vadd.f32 %v564_v39, %v371_v47  ;;  %v416_v39 = vpop.permute.xlu0 %415 }
  0xed   : > { %v1650_v56 = vadd.f32 %v566_v40, %v371_v47 }
  0xef   : > { %v570_v42 = vpop.f32.mrb[4].mxu0 }
  0xf0   : > { %v1636_v44 = vadd.f32 %v570_v42, %v376_v41  ;;  %v572_v45 = vpop.f32.mrb[5].mxu0 }
  0xf1   : > { %v1640_v48 = vadd.f32 %v572_v45, %v376_v41 }
  0xf2   : > { %v653_v49 = vmin.f32 %v1634_v43, %v1636_v44 }
  0xf3   : > { %v674_v51 = vmin.f32 %v1638_v46, %v1640_v48  ;;  %v576_v52 = vpop.f32.mrb[6].mxu0 }
  0xf4   : > { %v1648_v54 = vadd.f32 %v576_v52, %v381_v50  ;;  %v578_v55 = vpop.f32.mrb[7].mxu0 }
  0xf5   : > { %v1652_v57 = vadd.f32 %v578_v55, %v381_v50  ;;  %v421_v50 = vpop.permute.xlu1 %420 }
  0xf6   : > { %v654_v58 = vmin.f32 %v1646_v53, %v1648_v54 }
  0xf7   : > { %v675_v60 = vmin.f32 %v1650_v56, %v1652_v57  ;;  %v582_v61 = vpop.f32.mrb[8].mxu0 }
  0xf8   : > { %v1658_v62 = vadd.f32 %v582_v61, %v386_v59  ;;  %v584_v63 = vpop.f32.mrb[9].mxu0  ;;  %v426_v61 = vpop.permute.xlu0 %425 }
  0xf9   : > { %v1660_v0 = vadd.f32 %v584_v63, %v386_v59 }
  0xfa   : > { %v655_v1 = vmin.f32 %v653_v49, %v1658_v62 }
  0xfb   : > { %v676_v3 = vmin.f32 %v674_v51, %v1660_v0  ;;  %v588_v6 = vpop.f32.mrb[10].mxu0 }
  0xfc   : > { %v1664_v7 = vadd.f32 %v588_v6, %v391_v2  ;;  %v590_v8 = vpop.f32.mrb[11].mxu0 }
  0xfd   : > { %v1666_v9 = vadd.f32 %v590_v8, %v391_v2 }
  0xfe   : > { %v656_v10 = vmin.f32 %v654_v58, %v1664_v7 }
  0xff   : > { %v677_v12 = vmin.f32 %v675_v60, %v1666_v9  ;;  %v594_v13 = vpop.f32.mrb[12].mxu0 }
 0x100   : > { %v1670_v14 = vadd.f32 %v594_v13, %v396_v11  ;;  %v596_v15 = vpop.f32.mrb[13].mxu0 }
 0x101   : > { %v1672_v16 = vadd.f32 %v596_v15, %v396_v11 }
 0x102   : > { %v657_v17 = vmin.f32 %v655_v1, %v1670_v14 }
 0x103   : > { %v678_v19 = vmin.f32 %v676_v3, %v1672_v16  ;;  %v600_v20 = vpop.f32.mrb[14].mxu0 }
 0x104   : > { %v1676_v21 = vadd.f32 %v600_v20, %v401_v18  ;;  %v602_v22 = vpop.f32.mrb[15].mxu0 }
 0x105   : > { %v1678_v23 = vadd.f32 %v602_v22, %v401_v18 }
 0x106   : > { %v658_v24 = vmin.f32 %v656_v10, %v1676_v21  ;;  %v431_v10 = vpop.permute.xlu1 %430 }
 0x107   : > { %v679_v26 = vmin.f32 %v677_v12, %v1678_v23  ;;  %v606_v27 = vpop.f32.mrb[16].mxu0 }
 0x108   : > { %v1682_v28 = vadd.f32 %v606_v27, %v406_v25  ;;  %v608_v29 = vpop.f32.mrb[17].mxu0 }
 0x109   : > { %v1684_v30 = vadd.f32 %v608_v29, %v406_v25 }
 0x10a   : > { %v659_v31 = vmin.f32 %v657_v17, %v1682_v28  ;;  %v441_v29 = vpop.permute.xlu1 %440 }
 0x10b   : > { %v680_v33 = vmin.f32 %v678_v19, %v1684_v30  ;;  %v612_v34 = vpop.f32.mrb[18].mxu0  ;;  %v436_v19 = vpop.permute.xlu0 %435 }
 0x10c   : > { %v1688_v35 = vadd.f32 %v612_v34, %v411_v32  ;;  %v614_v36 = vpop.f32.mrb[19].mxu0 }
 0x10d   : > { %v1690_v37 = vadd.f32 %v614_v36, %v411_v32 }
 0x10e   : > { %v660_v38 = vmin.f32 %v658_v24, %v1688_v35 }
 0x10f   : > { %v681_v40 = vmin.f32 %v679_v26, %v1690_v37  ;;  %v618_v41 = vpop.f32.mrb[20].mxu0 }
 0x110   : > { %v1694_v42 = vadd.f32 %v618_v41, %v416_v39  ;;  %v620_v45 = vpop.f32.mrb[21].mxu0 }
 0x111   : > { %v1696_v47 = vadd.f32 %v620_v45, %v416_v39 }
 0x112   : > { %v661_v49 = vmin.f32 %v659_v31, %v1694_v42 }
 0x113   : > { %v682_v51 = vmin.f32 %v680_v33, %v1696_v47  ;;  %v624_v52 = vpop.f32.mrb[22].mxu0 }
 0x114   : > { %v1700_v55 = vadd.f32 %v624_v52, %v421_v50  ;;  %v626_v58 = vpop.f32.mrb[23].mxu0 }
 0x115   : > { %v1702_v59 = vadd.f32 %v626_v58, %v421_v50 }
 0x116   : > { %v662_v60 = vmin.f32 %v660_v38, %v1700_v55 }
 0x117   : > { %v683_v63 = vmin.f32 %v681_v40, %v1702_v59  ;;  %v630_v1 = vpop.f32.mrb[24].mxu0 }
 0x118   : > { %v1706_v2 = vadd.f32 %v630_v1, %v426_v61  ;;  %v632_v3 = vpop.f32.mrb[25].mxu0 }
 0x119   : > { %v1708_v6 = vadd.f32 %v632_v3, %v426_v61 }
 0x11a   : > { %v663_v8 = vmin.f32 %v661_v49, %v1706_v2  ;;  %v695_v49 = vlaneseq }
 0x11b   : > { %v684_v11 = vmin.f32 %v682_v51, %v1708_v6  ;;  %v636_v12 = vpop.f32.mrb[26].mxu0 }
 0x11c   : > { %v1712_v13 = vadd.f32 %v636_v12, %v431_v10  ;;  %v638_v15 = vpop.f32.mrb[27].mxu0 }
 0x11d   : > { %v1714_v17 = vadd.f32 %v638_v15, %v431_v10 }
 0x11e   : > { %v664_v18 = vmin.f32 %v662_v60, %v1712_v13  ;;  %v1731_v60 = vshrl.u32 %v695_v49, 7 }
 0x11f   : > { %v685_v20 = vmin.f32 %v683_v63, %v1714_v17  ;;  %v642_v22 = vpop.f32.mrb[28].mxu0 }
 0x120   : > { %v1718_v24 = vadd.f32 %v642_v22, %v436_v19  ;;  %v644_v25 = vpop.f32.mrb[29].mxu0  ;;  %v1737_v10 = vadd.s32 16, %v1731_v60  ;;  %v1743_v12 = vadd.s32 32, %v1731_v60  ;;  %v1746_v15 = vadd.s32 40, %v1731_v60 }
 0x121   : > { %v1720_v26 = vadd.f32 %v644_v25, %v436_v19  ;;  %v1757_v22 = vadd.s32 64, %v1731_v60  ;;  %v1760_v25 = vadd.s32 72, %v1731_v60 }
 0x122   : > { %v665_v27 = vmin.f32 %v663_v8, %v1718_v24  ;;  %v1734_v8 = vadd.s32 8, %v1731_v60 }
 0x123   : > { %v686_v31 = vmin.f32 %v684_v11, %v1720_v26  ;;  %v648_v32 = vpop.f32.mrb[30].mxu0  ;;  %v1740_v11 = vadd.s32 24, %v1731_v60 }
 0x124   : > { %v1724_v33 = vadd.f32 %v648_v32, %v441_v29  ;;  %v650_v34 = vpop.f32.mrb[31].mxu0 }
 0x125   : > { %v1726_v36 = vadd.f32 %v650_v34, %v441_v29  ;;  %v1766_v29 = vadd.s32 88, %v1731_v60  ;;  %v1804_v34 = vadd.s32 104, %v1731_v60 }
 0x126   : > { %v666_v38 = vmin.f32 %v664_v18, %v1724_v33  ;;  %v1749_v18 = vadd.s32 48, %v1731_v60 }
 0x127   : > { %v687_v39 = vmin.f32 %v685_v20, %v1726_v36  ;;  %v1754_v20 = vadd.s32 56, %v1731_v60 }
 0x128   : > { %v667_v40 = vmin.f32 %v665_v27, %v666_v38  ;;  %v1763_v27 = vadd.s32 80, %v1731_v60  ;;  %v1807_v38 = vadd.s32 112, %v1731_v60 }
 0x129   : > { %v688_v41 = vmin.f32 %v686_v31, %v687_v39  ;;  %v1769_v31 = vadd.s32 96, %v1731_v60  ;;  %v1810_v39 = vadd.s32 120, %v1731_v60 }
 0x12a   : > { %v668_v45 = vrot.slane %v667_v40, 4 }
 0x12b   : > { %v689_v50 = vrot.slane %v688_v41, 4 }
 0x12c   : > { %v669_v51 = vmin.f32 %v667_v40, %v668_v45 }
 0x12d   : > { %v690_v52 = vmin.f32 %v688_v41, %v689_v50 }
 0x12e   : > { %v670_v58 = vrot.slane %v669_v51, 2 }
 0x12f   : > { %v691_v61 = vrot.slane %v690_v52, 2 }
 0x130   : > { %v671_v63 = vmin.f32 %v669_v51, %v670_v58 }
 0x131   : > { %v692_v1 = vmin.f32 %v690_v52, %v691_v61 }
 0x132   : > { %v672_v3 = vrot.slane %v671_v63, 1 }
 0x133   : > { %v693_v32 = vrot.slane %v692_v1, 1 }
 0x134   : > { %v1751_v19 = vmin.f32 %v671_v63, %v672_v3 }
 0x135   : > { %v1812_v40 = vmin.f32 %v692_v1, %v693_v32 }
 0x136   : > { %vm712_vm1 = vcmp.eq.f32.partialorder %v1634_v43, %v1751_v19  ;;  %vm714_vm2 = vcmp.eq.f32.partialorder %v1646_v53, %v1751_v19  ;;  %vm716_vm3 = vcmp.eq.f32.partialorder %v1636_v44, %v1751_v19  ;;  %vm718_vm4 = vcmp.eq.f32.partialorder %v1648_v54, %v1751_v19 }
 0x137   : > { %vm720_vm5 = vcmp.eq.f32.partialorder %v1658_v62, %v1751_v19  ;;  %vm722_vm6 = vcmp.eq.f32.partialorder %v1664_v7, %v1751_v19  ;;  %vm724_vm7 = vcmp.eq.f32.partialorder %v1670_v14, %v1751_v19  ;;  %vm726_vm8 = vcmp.eq.f32.partialorder %v1676_v21, %v1751_v19 }
 0x138   : > { %vm728_vm9 = vcmp.eq.f32.partialorder %v1682_v28, %v1751_v19  ;;  %vm730_vm10 = vcmp.eq.f32.partialorder %v1688_v35, %v1751_v19  ;;  %vm732_vm11 = vcmp.eq.f32.partialorder %v1694_v42, %v1751_v19  ;;  %vm734_vm12 = vcmp.eq.f32.partialorder %v1700_v55, %v1751_v19 }
 0x139   : > { %vm736_vm13 = vcmp.eq.f32.partialorder %v1706_v2, %v1751_v19  ;;  %vm738_vm14 = vcmp.eq.f32.partialorder %v1712_v13, %v1751_v19  ;;  %vm740_vm15 = vcmp.eq.f32.partialorder %v1718_v24, %v1751_v19  ;;  %vm742_vm0 = vcmp.eq.f32.partialorder %v1724_v33, %v1751_v19 }
 0x13a   : > { %v744_v41 = vsel %vm712_vm1, %v1731_v60, 128  ;;  %v746_v45 = vsel %vm714_vm2, %v1734_v8, 128  ;;  %v748_v50 = vsel %vm716_vm3, %v1737_v10, 128  ;;  %v750_v51 = vsel %vm718_vm4, %v1740_v11, 128 }
 0x13b   : > { %v752_v43 = vsel %vm720_vm5, %v1743_v12, 128  ;;  %v754_v53 = vsel %vm722_vm6, %v1746_v15, 128  ;;  %v756_v44 = vsel %vm724_vm7, %v1749_v18, 128  ;;  %v758_v54 = vsel %vm726_vm8, %v1754_v20, 128 }
 0x13c   : > { %v760_v62 = vsel %vm728_vm9, %v1757_v22, 128  ;;  %v762_v7 = vsel %vm730_vm10, %v1760_v25, 128  ;;  %v764_v14 = vsel %vm732_vm11, %v1763_v27, 128  ;;  %v766_v21 = vsel %vm734_vm12, %v1766_v29, 128 }
 0x13d   : > { %vm776_vm1 = vcmp.lt.s32.totalorder %v744_v41, %v748_v50  ;;  %vm778_vm2 = vcmp.lt.s32.totalorder %v746_v45, %v750_v51  ;;  %vm713_vm3 = vcmp.eq.f32.partialorder %v1638_v46, %v1812_v40  ;;  %vm715_vm4 = vcmp.eq.f32.partialorder %v1650_v56, %v1812_v40 }
 0x13e   : > { %v777_v28 = vsel %vm776_vm1, %v744_v41, %v748_v50  ;;  %v779_v35 = vsel %vm778_vm2, %v746_v45, %v750_v51  ;;  %vm729_vm6 = vcmp.eq.f32.partialorder %v1684_v30, %v1812_v40  ;;  %vm737_vm12 = vcmp.eq.f32.partialorder %v1708_v6, %v1812_v40 }
 0x13f   : > { %vm780_vm7 = vcmp.lt.s32.totalorder %v777_v28, %v752_v43  ;;  %vm782_vm8 = vcmp.lt.s32.totalorder %v779_v35, %v754_v53  ;;  %vm739_vm9 = vcmp.eq.f32.partialorder %v1714_v17, %v1812_v40  ;;  %v768_v1 = vsel %vm736_vm13, %v1769_v31, 128 }
 0x140   : > { %v781_v42 = vsel %vm780_vm7, %v777_v28, %v752_v43  ;;  %v783_v55 = vsel %vm782_vm8, %v779_v35, %v754_v53  ;;  %vm735_vm8 = vcmp.eq.f32.partialorder %v1702_v59, %v1812_v40  ;;  %v770_v3 = vsel %vm738_vm14, %v1804_v34, 128 }
 0x141   : > { %vm784_vm1 = vcmp.lt.s32.totalorder %v781_v42, %v756_v44  ;;  %vm786_vm2 = vcmp.lt.s32.totalorder %v783_v55, %v758_v54  ;;  %v772_v45 = vsel %vm740_vm15, %v1807_v38, 128  ;;  %v774_v50 = vsel %vm742_vm0, %v1810_v39, 128 }
 0x142   : > { %v785_v52 = vsel %vm784_vm1, %v781_v42, %v756_v44  ;;  %v787_v58 = vsel %vm786_vm2, %v783_v55, %v758_v54  ;;  %vm741_vm1 = vcmp.eq.f32.partialorder %v1720_v26, %v1812_v40  ;;  %vm743_vm2 = vcmp.eq.f32.partialorder %v1726_v36, %v1812_v40 }
 0x143   : > { %vm788_vm11 = vcmp.lt.s32.totalorder %v785_v52, %v760_v62  ;;  %vm790_vm10 = vcmp.lt.s32.totalorder %v787_v58, %v762_v7  ;;  %v745_v13 = vsel %vm713_vm3, %v1731_v60, 128  ;;  %v747_v24 = vsel %vm715_vm4, %v1734_v8, 128 }
 0x144   : > { %v789_v61 = vsel %vm788_vm11, %v785_v52, %v760_v62  ;;  %v791_v63 = vsel %vm790_vm10, %v787_v58, %v762_v7  ;;  %vm2080_vm15 = vcmp.eq.f32.partialorder %v1640_v48, %v1812_v40  ;;  %vm2081_vm0 = vcmp.eq.f32.partialorder %v1652_v57, %v1812_v40 }
 0x145   : > { %vm792_vm7 = vcmp.lt.s32.totalorder %v789_v61, %v764_v14  ;;  %vm794_vm5 = vcmp.lt.s32.totalorder %v791_v63, %v766_v21  ;;  %v749_v33 = vsel %vm2080_vm15, %v1737_v10, 128  ;;  %v751_v19 = vsel %vm2081_vm0, %v1740_v11, 128 }
 0x146   : > { %v793_v32 = vsel %vm792_vm7, %v789_v61, %v764_v14  ;;  %v795_v41 = vsel %vm794_vm5, %v791_v63, %v766_v21  ;;  %vm2082_vm4 = vcmp.eq.f32.partialorder %v1660_v0, %v1812_v40  ;;  %vm815_vm5 = vcmp.lt.s32.totalorder %v745_v13, %v749_v33 }
 0x147   : > { %vm796_vm10 = vcmp.lt.s32.totalorder %v793_v32, %v768_v1  ;;  %vm798_vm11 = vcmp.lt.s32.totalorder %v795_v41, %v770_v3  ;;  %v753_v56 = vsel %vm2082_vm4, %v1743_v12, 128  ;;  %vm817_vm7 = vcmp.lt.s32.totalorder %v747_v24, %v751_v19 }
 0x148   : > { %v797_v2 = vsel %vm796_vm10, %v793_v32, %v768_v1  ;;  %v799_v51 = vsel %vm798_vm11, %v795_v41, %v770_v3  ;;  %vm2083_vm10 = vcmp.eq.f32.partialorder %v1666_v9, %v1812_v40  ;;  %v816_v54 = vsel %vm815_vm5, %v745_v13, %v749_v33 }
 0x149   : > { %vm800_vm13 = vcmp.lt.s32.totalorder %v797_v2, %v772_v45  ;;  %vm802_vm14 = vcmp.lt.s32.totalorder %v799_v51, %v774_v50  ;;  %v755_v48 = vsel %vm2083_vm10, %v1746_v15, 128  ;;  %v818_v57 = vsel %vm817_vm7, %v747_v24, %v751_v19 }
 0x14a   : > { %v801_v43 = vsel %vm800_vm13, %v797_v2, %v772_v45  ;;  %v803_v46 = vsel %vm802_vm14, %v799_v51, %v774_v50  ;;  %vm2084_vm11 = vcmp.eq.f32.partialorder %v1672_v16, %v1812_v40  ;;  %vm819_vm13 = vcmp.lt.s32.totalorder %v816_v54, %v753_v56 }
 0x14b   : > { %vm804_vm3 = vcmp.lt.s32.totalorder %v801_v43, %v803_v46  ;;  %v757_v62 = vsel %vm2084_vm11, %v1749_v18, 128  ;;  %vm821_vm14 = vcmp.lt.s32.totalorder %v818_v57, %v755_v48  ;;  %vm2085_vm0 = vcmp.eq.f32.partialorder %v1678_v23, %v1812_v40 }
 0x14c   : > { %v805_v53 = vsel %vm804_vm3, %v801_v43, %v803_v46  ;;  %v759_v0 = vsel %vm2085_vm0, %v1754_v20, 128  ;;  %v820_v7 = vsel %vm819_vm13, %v816_v54, %v753_v56  ;;  %v822_v14 = vsel %vm821_vm14, %v818_v57, %v755_v48 }
 0x14d   : > { %v806_v44 = vrot.slane %v805_v53, 4  ;;  %vm823_vm3 = vcmp.lt.s32.totalorder %v820_v7, %v757_v62  ;;  %vm825_vm4 = vcmp.lt.s32.totalorder %v822_v14, %v759_v0  ;;  %v761_v9 = vsel %vm729_vm6, %v1757_v22, 128 }
 0x14e   : > { %vm2086_vm5 = vcmp.eq.f32.partialorder %v1690_v37, %v1812_v40  ;;  %v824_v28 = vsel %vm823_vm3, %v820_v7, %v757_v62  ;;  %v826_v35 = vsel %vm825_vm4, %v822_v14, %v759_v0  ;;  %vm2087_vm7 = vcmp.eq.f32.partialorder %v1696_v47, %v1812_v40 }
 0x14f   : > { %vm807_vm15 = vcmp.lt.s32.totalorder %v805_v53, %v806_v44  ;;  %v763_v16 = vsel %vm2086_vm5, %v1760_v25, 128  ;;  %v765_v23 = vsel %vm2087_vm7, %v1763_v27, 128  ;;  %vm827_vm10 = vcmp.lt.s32.totalorder %v824_v28, %v761_v9 }
 0x150   : > { %v808_v21 = vsel %vm807_vm15, %v805_v53, %v806_v44  ;;  %vm829_vm11 = vcmp.lt.s32.totalorder %v826_v35, %v763_v16  ;;  %v767_v30 = vsel %vm735_vm8, %v1766_v29, 128  ;;  %v828_v55 = vsel %vm827_vm10, %v824_v28, %v761_v9 }
 0x151   : > { %v809_v42 = vrot.slane %v808_v21, 2  ;;  %v830_v52 = vsel %vm829_vm11, %v826_v35, %v763_v16  ;;  %vm831_vm6 = vcmp.lt.s32.totalorder %v828_v55, %v765_v23  ;;  %v769_v37 = vsel %vm737_vm12, %v1769_v31, 128 }
 0x152   : > { %vm833_vm13 = vcmp.lt.s32.totalorder %v830_v52, %v767_v30  ;;  %v771_v47 = vsel %vm739_vm9, %v1804_v34, 128  ;;  %v832_v58 = vsel %vm831_vm6, %v828_v55, %v765_v23  ;;  %v773_v59 = vsel %vm741_vm1, %v1807_v38, 128 }
 0x153   : > { %v834_v61 = vsel %vm833_vm13, %v830_v52, %v767_v30  ;;  %vm835_vm8 = vcmp.lt.s32.totalorder %v832_v58, %v769_v37  ;;  %vm810_vm15 = vcmp.lt.s32.totalorder %v808_v21, %v809_v42  ;;  %v775_v6 = vsel %vm743_vm2, %v1810_v39, 128 }
 0x154   : > { %vm837_vm14 = vcmp.lt.s32.totalorder %v834_v61, %v771_v47  ;;  %v836_v63 = vsel %vm835_vm8, %v832_v58, %v769_v37  ;;  %v811_v32 = vsel %vm810_vm15, %v808_v21, %v809_v42  ;;  %v1436_v50 = vmov 1966171168  }
 0x155   : > { %v838_v1 = vsel %vm837_vm14, %v834_v61, %v771_v47  ;;  %vm839_vm12 = vcmp.lt.s32.totalorder %v836_v63, %v773_v59  ;;  %v812_v26 = vrot.slane %v811_v32, 1  ;;  %v1026_v2 = vunpack.c.l.s4 %v1436_v50 }
 0x156   : > { %vm841_vm0 = vcmp.lt.s32.totalorder %v838_v1, %v775_v6  ;;  %v840_v17 = vsel %vm839_vm12, %v836_v63, %v773_v59  ;;  %v1437_v56 = vmov 1.0|1.0   ;;  %vm1041_vm15 = vcmp.lt.s32.totalorder %v695_v49, 256  ;;  %v950_v49 = vld [vmem:[%s2076_s3] sm:$0xff] }
 0x157   : > { %v842_v3 = vsel %vm841_vm0, %v838_v1, %v775_v6  ;;  %vm813_vm3 = vcmp.lt.s32.totalorder %v811_v32, %v812_v26  ;;  %v1027_v36 = vunpack.c.0.s8 %v1026_v2 }
 0x158   : > { %vm843_vm9 = vcmp.lt.s32.totalorder %v840_v17, %v842_v3  ;;  %v1974_v24 = vsel %vm813_vm3, %v811_v32, %v812_v26 }
 0x159   : > { %v844_v41 = vsel %vm843_vm9, %v840_v17, %v842_v3  ;;  %v1030_v19 = vsub.s32 %v1027_v36, %v1731_v60  ;;  %vm854_vm5 = vcmp.eq.s32.totalorder %v1731_v60, %v1974_v24  ;;  %vm856_vm7 = vcmp.eq.s32.totalorder %v1734_v8, %v1974_v24 }
 0x15a   : > { %v845_v45 = vrot.slane %v844_v41, 4  ;;  %vm1348_vm14 = vmpackc.low %vm856_vm7, %vm854_vm5  ;;  %vm858_vm0 = vcmp.eq.s32.totalorder %v1737_v10, %v1974_v24  ;;  %vm860_vm9 = vcmp.eq.s32.totalorder %v1740_v11, %v1974_v24  ;;  %vm862_vm5 = vcmp.eq.s32.totalorder %v1743_v12, %v1974_v24 }
 0x15b   : > { %vm864_vm7 = vcmp.eq.s32.totalorder %v1746_v15, %v1974_v24 }
 0x15c   : > { %vm846_vm1 = vcmp.lt.s32.totalorder %v844_v41, %v845_v45 }
 0x15d   : > { %v847_v51 = vsel %vm846_vm1, %v844_v41, %v845_v45 }
 0x15e   : > { %v848_v13 = vrot.slane %v847_v51, 2 }
 0x160   : > { %vm849_vm4 = vcmp.lt.s32.totalorder %v847_v51, %v848_v13 }
 0x161   : > { %v850_v40 = vsel %vm849_vm4, %v847_v51, %v848_v13  ;;  %vm1352_vm4 = vmpackc.low %vm860_vm9, %vm858_vm0 }
 0x162   : > { %v851_v33 = vrot.slane %v850_v40, 1 }
 0x164   : > { %vm852_vm2 = vcmp.lt.s32.totalorder %v850_v40, %v851_v33 }
 0x165   : > { %v1977_v43 = vsel %vm852_vm2, %v850_v40, %v851_v33 }
 0x166   : > { %v1024_v46 = vcombine.low %v1974_v24, %v1977_v43  ;;  %vm855_vm10 = vcmp.eq.s32.totalorder %v1731_v60, %v1977_v43  ;;  %vm857_vm11 = vcmp.eq.s32.totalorder %v1734_v8, %v1977_v43  ;;  %vm859_vm6 = vcmp.eq.s32.totalorder %v1737_v10, %v1977_v43 }
 0x167   : > { %vm1346_vm13 = vmpackc.low %vm857_vm11, %vm855_vm10  ;;  %vm861_vm8 = vcmp.eq.s32.totalorder %v1740_v11, %v1977_v43  ;;  %vm863_vm1 = vcmp.eq.s32.totalorder %v1743_v12, %v1977_v43  ;;  %vm865_vm3 = vcmp.eq.s32.totalorder %v1746_v15, %v1977_v43  ;;  %vm867_vm10 = vcmp.eq.s32.totalorder %v1749_v18, %v1977_v43 }
 0x168   : > { %v1031_v53 = vrot.slane %v1024_v46, %v1030_v19  ;;  %1347 = vmatprep.subr.msk.bf16.mxu1 %vm1346_vm13, %v1437_v56  ;;  %vm1350_vm12 = vmpackc.low %vm861_vm8, %vm859_vm6  ;;  %vm869_vm11 = vcmp.eq.s32.totalorder %v1754_v20, %v1977_v43  ;;  %vm866_vm8 = vcmp.eq.s32.totalorder %v1749_v18, %v1974_v24 }
 0x169   : > { %1349 = vmatpush1.bf16.msk.msra.mxu1 %vm1348_vm14, %v1437_v56  ;;  %vm1354_vm2 = vmpackc.low %vm865_vm3, %vm863_vm1  ;;  %vm868_vm14 = vcmp.eq.s32.totalorder %v1754_v20, %v1974_v24  ;;  %vm870_vm1 = vcmp.eq.s32.totalorder %v1757_v22, %v1974_v24  ;;  %vm872_vm3 = vcmp.eq.s32.totalorder %v1760_v25, %v1974_v24 }
 0x16a   : > { %v1038_v60 = vrot.slane %v1031_v53, %v1030_v19  ;;  %1351 = vmatprep.subr.msk.bf16.mxu1 %vm1350_vm12, %v1437_v56  ;;  %vm1356_vm6 = vmpackc.low %vm864_vm7, %vm862_vm5  ;;  %vm873_vm12 = vcmp.eq.s32.totalorder %v1760_v25, %v1977_v43 }
 0x16b   : > { %vm1358_vm13 = vmpackc.low %vm869_vm11, %vm867_vm10  ;;  %vm874_vm10 = vcmp.eq.s32.totalorder %v1763_v27, %v1974_v24  ;;  %vm876_vm11 = vcmp.eq.s32.totalorder %v1766_v29, %v1974_v24 }
 0x16c   : > { %1043 = vst.msk [vmem:[%s321_s15] sm:$0x3] %vm1041_vm15, %v1038_v60  ;;  %vm871_vm15 = vcmp.eq.s32.totalorder %v1757_v22, %v1977_v43  ;;  %vm1360_vm0 = vmpackc.low %vm868_vm14, %vm866_vm8 }
 0x16d   : > { %1353 = vmatpush1.bf16.msk.msra.mxu1 %vm1352_vm4, %v1437_v56  ;;  %vm1362_vm9 = vmpackc.low %vm873_vm12, %vm871_vm15  ;;  %vm875_vm4 = vcmp.eq.s32.totalorder %v1763_v27, %v1977_v43  ;;  %vm878_vm15 = vcmp.eq.s32.totalorder %v1769_v31, %v1974_v24  ;;  %vm880_vm12 = vcmp.eq.s32.totalorder %v1804_v34, %v1974_v24 }
 0x16e   : > { %1355 = vmatprep.subr.msk.bf16.mxu1 %vm1354_vm2, %v1437_v56  ;;  %vm877_vm2 = vcmp.eq.s32.totalorder %v1766_v29, %v1977_v43  ;;  %vm1364_vm5 = vmpackc.low %vm872_vm3, %vm870_vm1 }
 0x16f   : > { %vm1366_vm7 = vmpackc.low %vm877_vm2, %vm875_vm4  ;;  %vm882_vm4 = vcmp.eq.s32.totalorder %v1807_v38, %v1974_v24  ;;  %vm884_vm2 = vcmp.eq.s32.totalorder %v1810_v39, %v1974_v24 }
 0x170   : > { %vm1368_vm8 = vmpackc.low %vm876_vm11, %vm874_vm10 }
 0x171   : > { %1357 = vmatpush1.bf16.msk.msra.mxu1 %vm1356_vm6, %v1437_v56  ;;  %vm879_vm6 = vcmp.eq.s32.totalorder %v1769_v31, %v1977_v43  ;;  %vm1372_vm1 = vmpackc.low %vm880_vm12, %vm878_vm15 }
 0x172   : > { %1359 = vmatprep.subr.msk.bf16.mxu1 %vm1358_vm13, %v1437_v56  ;;  %vm881_vm13 = vcmp.eq.s32.totalorder %v1804_v34, %v1977_v43 }
 0x173   : > { %vm1370_vm14 = vmpackc.low %vm881_vm13, %vm879_vm6 }
 0x175   : > { %1361 = vmatpush1.bf16.msk.msra.mxu1 %vm1360_vm0, %v1437_v56  ;;  %vm883_vm0 = vcmp.eq.s32.totalorder %v1807_v38, %v1977_v43 }
 0x176   : > { %1363 = vmatprep.subr.msk.bf16.mxu1 %vm1362_vm9, %v1437_v56  ;;  %vm885_vm9 = vcmp.eq.s32.totalorder %v1810_v39, %v1977_v43 }
 0x177   : > { %vm1374_vm3 = vmpackc.low %vm885_vm9, %vm883_vm0 }
 0x179   : > { %1365 = vmatpush1.bf16.msk.msra.mxu1 %vm1364_vm5, %v1437_v56  ;;  %vm1376_vm5 = vmpackc.low %vm884_vm2, %vm882_vm4 }
 0x17a   : > { %1367 = vmatprep.subr.msk.bf16.mxu1 %vm1366_vm7, %v1437_v56  ;;  %vm1071_vm7 = vcmask 1040384  }
 0x17d   : > { %1369 = vmatpush1.bf16.msk.msra.mxu1 %vm1368_vm8, %v1437_v56 }
 0x17e   : > { %1371 = vmatprep.subr.msk.bf16.mxu1 %vm1370_vm14, %v1437_v56 }
 0x181   : > { %1373 = vmatpush1.bf16.msk.msra.mxu1 %vm1372_vm1, %v1437_v56 }
 0x182   : > { %1375 = vmatprep.subr.msk.bf16.mxu1 %vm1374_vm3, %v1437_v56 }
 0x185   : > { %1377 = vmatpush1.bf16.msk.msra.mxu1 %vm1376_vm5, %v1437_v56 }
 0x188   : > { %1016 = vmatmul.mubr.f32.vlgmr.msra.gmra.mrb[0].mxu1 %v950_v49 }
 0x25b   : > { %v1017_v8 = vpop.f32.mrb[0].mxu1 }
 0x25c   : > { %v1044_v10 = vsub.f32 %v1017_v8, %v1509_v5  ;;  %v1019_v11 = vpop.f32.mrb[1].mxu1  ;;  %1022 = vst [vmem:[%s312_s20] sm:$0xff] %v1017_v8 }
 0x25d   : > { %1023 = vst [vmem:[%s312_s20 + $0x8] sm:$0xff] %v1019_v11  ;;  %v1045_v12 = vsub.f32 %v1019_v11, %v1507_v4 }
 0x25e   : > { %v1046_v15 = vmul.f32 %v1044_v10, %v1044_v10 }
 0x25f   : > { %v1047_v18 = vmul.f32 %v1045_v12, %v1045_v12 }
 0x260   : > { %v1048_v20 = vrot.slane %v1046_v15, 4 }
 0x261   : > { %v1054_v22 = vrot.slane %v1047_v18, 4 }
 0x262   : > { %v1049_v25 = vadd.f32 %v1048_v20, %v1046_v15 }
 0x263   : > { %v1055_v27 = vadd.f32 %v1054_v22, %v1047_v18 }
 0x264   : > { %v1050_v29 = vrot.slane %v1049_v25, 2 }
 0x265   : > { %v1056_v31 = vrot.slane %v1055_v27, 2 }
 0x266   : > { %v1051_v34 = vadd.f32 %v1050_v29, %v1049_v25 }
 0x267   : > { %v1057_v38 = vadd.f32 %v1056_v31, %v1055_v27 }
 0x268   : > { %v1052_v39 = vrot.slane %v1051_v34, 1 }
 0x269   : > { %v1058_v44 = vrot.slane %v1057_v38, 1 }
 0x26a   : > { %v1053_v5 = vadd.f32 %v1052_v39, %v1051_v34 }
 0x26b   : > { %v1059_v48 = vadd.f32 %v1058_v44, %v1057_v38 }
 0x26c   : > { %v1072_v54 = vsel %vm1071_vm7, %v1053_v5, 0.0 }
 0x26d   : > { %v1073_v57 = vsel %vm1071_vm7, %v1059_v48, 0.0 }
 0x26e   : > { %v1074_v62 = vadd.f32 %v1073_v57, %v1072_v54 }
 0x270   : > { %1075 = vadd.xlane.f32.xlu0 %v1074_v62 }
 0x2fd   : > { %v1076_v4 = vpop.xlane.xlu0 %1075 }
 0x2fe   : > { %v1077_v0 = vrot.slane %v1076_v4, 4 }
 0x300   : > { %v1078_v7 = vadd.f32 %v1077_v0, %v1076_v4 }
 0x302   : > { %v1079_v14 = vrot.slane %v1078_v7, 2 }
 0x304   : > { %v1080_v21 = vadd.f32 %v1079_v14, %v1078_v7 }
 0x306   : > { %v1081_v9 = vrot.slane %v1080_v21, 1 }
 0x308   : > { %v1082_v16 = vadd.f32 %v1081_v9, %v1080_v21 }
 0x30a   : > { %1378 = vpush %v1082_v16 }
 0x33b   : > { %s1379_s28 = spop %1378 }
 0x33c   : > { %v1084_v28 = vstv %s1379_s28 }
 0x33d   : > { %1085 = vst [vmem:[%s328_s27] sm:$0x1] %v1084_v28 }
 0x33e PF: > { %s17_s23 = sadd.s32 1, %s1432_s23   ;;  %s2088_s21 = smov %s1428_s22 }
 0x33f   : > { %p14_p5 = scmp.ge.s32.totalorder %s17_s23, 4   ;;  %s2089_s22 = smov %s2091_s24 }
 0x341   :  { %16 = sbr.rel (!%p14_p5) target bundleno = 2 (0x2), region = 90 }

</bundles_post_ra>
